<compile_context>
chip_gen: v7x
topology: tpu7x:2x2x1
jax: 0.10.0
libtpu: 0.0.40
codegen_flags: <defaults>
</compile_context>

<pallas_src>
import functools

import jax
import jax.numpy as jnp
import numpy as np
from jax import lax
from jax.experimental import pallas as pl
from jax.experimental.pallas import tpu as pltpu

EPS = 1e-5


# --------------------------------------------------------------------------
# Host-side (numpy, once per layer) banded conv weights with the width "same"
# padding folded in:
#   band[dy*W*Cin + xi*Cin + ci, xo*Cout + co] = w[dy, xi - xo + 1, ci, co]
#   for |xi - xo| <= 1 (band clipped at the width edges), else 0.
# Row order matches the kernel's concat([x[:, dy:dy+H, :] for dy], axis=-1).
# --------------------------------------------------------------------------
def make_band_weights(w_hwio, width):
    wnp = np.asarray(w_hwio, np.float32)
    k, _, cin, cout = wnp.shape  # k == 3
    band = np.zeros((k, width * cin, width * cout), np.float32)
    for dy in range(k):
        for xo in range(width):
            for dx in range(k):
                xi = xo + dx - 1
                if 0 <= xi < width:
                    band[dy,
                         xi * cin:(xi + 1) * cin,
                         xo * cout:(xo + 1) * cout] = wnp[dy, dx]
    return jnp.asarray(band.reshape(k * width * cin, width * cout),
                       jnp.bfloat16)


def prepare_double_conv_params(w1, g1, be1, w2, g2, be2, width):
    """Precompute per-layer kernel operands (call once, reuse every forward).

    Conv biases are intentionally dropped: training-mode BatchNorm subtracts
    the batch mean, which exactly cancels any per-channel constant added
    after the conv, so the bias adds are dead work in this fused forward.
    """
    cout = w1.shape[-1]
    assert width & (width - 1) == 0, "lane tree-reduce assumes power-of-2 W"
    # TODO(synk): for non power-of-two W, replace the roll tree-reduce in
    # _bn_relu_lane with a matmul against a (W*C, W*C) channel-sum matrix.

    def lane(v):  # (Cout,) -> (1, W*Cout), channel fastest along lanes
        return jnp.tile(jnp.asarray(v, jnp.float32).reshape(-1),
                        width).reshape(1, width * cout)

    return (make_band_weights(w1, width), lane(g1), lane(be1),
            make_band_weights(w2, width), lane(g2), lane(be2))


# --------------------------------------------------------------------------
# In-kernel BatchNorm (training-mode batch stats) + ReLU, lane-dense layout.
# acc: (rows, W*Cout) f32; lane index = x*Cout + c (channel fastest).
# --------------------------------------------------------------------------
def _bn_relu_lane(acc, gamma_lane, beta_lane, w, cout, count):
    inv_n = 1.0 / float(count)
    # Per-lane partial sums over rows (cheap sublane reduction), one sweep for
    # both sum and sum-of-squares.
    stats = jnp.concatenate(
        [jnp.sum(acc, axis=0, keepdims=True),
         jnp.sum(acc * acc, axis=0, keepdims=True)], axis=0)  # (2, W*Cout)
    # Lane-space cyclic tree-reduce over the W width groups: after log2(W)
    # roll+add steps every lane holds its channel's total (XLU rotations,
    # no lane<->sublane relayout).
    shift = cout
    while shift < w * cout:
        stats = stats + pltpu.roll(stats, shift=shift, axis=1)
        shift *= 2
    mean = stats[0:1] * inv_n
    var = stats[1:2] * inv_n - mean * mean                     # E[x^2]-mean^2
    out = (acc - mean) * lax.rsqrt(var + EPS) * gamma_lane + beta_lane
    return jnp.maximum(out, 0.0)


# --------------------------------------------------------------------------
# Fused DoubleConv kernel.
#   x_ref : (N, H+2, W*Cin)      bf16, height-padded only, lane-dense
#   w1_ref: (3*W*Cin,  W*Cout)   bf16, banded conv1 weights (width pad folded)
#   w2_ref: (3*W*Cout, W*Cout)   bf16, banded conv2 weights
#   g/be  : (1, W*Cout)          f32, per-lane BN affine params
#   o_ref : (N, H, W*Cout)       f32, lane-dense
# --------------------------------------------------------------------------
def _double_conv_kernel(x_ref, w1_ref, g1_ref, be1_ref,
                        w2_ref, g2_ref, be2_ref, o_ref, *, cout):
    n, hp, w_cin = x_ref.shape
    h = hp - 2
    nh = n * h
    w_cout = o_ref.shape[-1]
    w = w_cout // cout
    count = n * h * w

    x = x_ref[...]                                          # bf16

    # ---- conv1: one MXU pass, K = 3*W*Cin (3 dy taps fused along K) -------
    lhs1 = jnp.concatenate(
        [x[:, 0:h, :], x[:, 1:1 + h, :], x[:, 2:2 + h, :]],
        axis=-1).reshape(nh, 3 * w_cin)
    acc = jnp.dot(lhs1, w1_ref[...], preferred_element_type=jnp.float32)

    # ---- batchnorm1 (batch stats over N*H*W) + ReLU, f32 on VPU ------------
    y = _bn_relu_lane(acc, g1_ref[...], be1_ref[...], w, cout, count)

    # ---- height re-pad only (width padding lives in the banded weights) ----
    yb = y.astype(jnp.bfloat16).reshape(n, h, w_cout)
    zrow = jnp.zeros((n, 1, w_cout), jnp.bfloat16)
    yb = jnp.concatenate([zrow, yb, zrow], axis=1)           # (N, H+2, W*Cout)

    # ---- conv2: one MXU pass, K = 3*W*Cout ----------------------------------
    lhs2 = jnp.concatenate(
        [yb[:, 0:h, :], yb[:, 1:1 + h, :], yb[:, 2:2 + h, :]],
        axis=-1).reshape(nh, 3 * w_cout)
    acc2 = jnp.dot(lhs2, w2_ref[...], preferred_element_type=jnp.float32)

    # ---- batchnorm2 + ReLU; lane-dense store --------------------------------
    z = _bn_relu_lane(acc2, g2_ref[...], be2_ref[...], w, cout, count)
    o_ref[...] = z.reshape(n, h, w_cout)


# --------------------------------------------------------------------------
# Public wrapper: NCHW in / NCHW out (PyTorch convention).  The transposes /
# layout folding are boundary glue — in a full UNet, keep activations in the
# lane-dense (N, H, W*C) layout across layers and transpose once at the ends.
# --------------------------------------------------------------------------
def double_conv(x_nchw, params, cout):
    n, cin, h, w = x_nchw.shape

    # NCHW -> NHWC -> fold (W, C) into lanes -> height pad -> bf16 MXU operand.
    x = jnp.transpose(x_nchw, (0, 2, 3, 1)).reshape(n, h, w * cin)
    x = jnp.pad(x, ((0, 0), (1, 1), (0, 0))).astype(jnp.bfloat16)

    w1b, g1l, be1l, w2b, g2l, be2l = params
    vmem = pl.BlockSpec(memory_space=pltpu.MemorySpace.VMEM)
    out = pl.pallas_call(
        functools.partial(_double_conv_kernel, cout=cout),
        out_shape=jax.ShapeDtypeStruct((n, h, w * cout), jnp.float32),
        in_specs=[vmem] * 7,
        out_specs=vmem,
    )(x, w1b, g1l, be1l, w2b, g2l, be2l)

    out = out.reshape(n, h, w, cout)
    return jnp.transpose(out, (0, 3, 1, 2))


# ----------------------- pure-JAX reference (for checking) ------------------
def _ref_double_conv(x_nchw, w1, b1, g1, be1, w2, b2, g2, be2):
    # Mirrors the kernel's bf16-operand / f32-accumulate MXU path (including
    # the bf16 re-quantized intermediate) and PyTorch training-mode BN.
    def conv(x, wgt, b):  # wgt: HWIO
        y = lax.conv_general_dilated(
            x.astype(jnp.bfloat16), wgt.astype(jnp.bfloat16),
            window_strides=(1, 1), padding="SAME",
            dimension_numbers=("NCHW", "HWIO", "NCHW"),
            preferred_element_type=jnp.float32)
        return y + b.reshape(1, -1, 1, 1)

    def bn_relu(y, g, be):
        mean = jnp.mean(y, axis=(0, 2, 3), keepdims=True)
        var = jnp.mean((y - mean) ** 2, axis=(0, 2, 3), keepdims=True)
        z = (y - mean) * lax.rsqrt(var + EPS) * g.reshape(1, -1, 1, 1) \
            + be.reshape(1, -1, 1, 1)
        return jnp.maximum(z, 0.0)

    y = bn_relu(conv(x_nchw, w1, b1), g1, be1)
    return bn_relu(conv(y, w2, b2), g2, be2)


if __name__ == "__main__":
    N, Cin, Cout, H, W = 2, 4, 8, 16, 16

    key = jax.random.PRNGKey(0)
    kx, k1, k2, k3, k4 = jax.random.split(key, 5)

    # Shapes follow nn.Conv2d (HWIO here) / nn.BatchNorm2d defaults.
    x = jax.random.normal(kx, (N, Cin, H, W), jnp.float32)
    w1 = jax.random.normal(k1, (3, 3, Cin, Cout), jnp.float32) * 0.1
    b1 = jax.random.normal(k2, (Cout,), jnp.float32) * 0.1
    w2 = jax.random.normal(k3, (3, 3, Cout, Cout), jnp.float32) * 0.1
    b2 = jax.random.normal(k4, (Cout,), jnp.float32) * 0.1
    g1 = jnp.ones((Cout,), jnp.float32)    # BatchNorm2d default weight
    be1 = jnp.zeros((Cout,), jnp.float32)  # BatchNorm2d default bias
    g2 = jnp.ones((Cout,), jnp.float32)
    be2 = jnp.zeros((Cout,), jnp.float32)

    # Per-layer prep (banded weights, lane-tiled BN params) — built once,
    # reused across forward calls.  Conv biases are dropped (cancelled by
    # training-mode BN centering); the reference keeps them.
    params = prepare_double_conv_params(w1, g1, be1, w2, g2, be2, width=W)

    out = double_conv(x, params, cout=Cout)
    out = jax.block_until_ready(out)

    ref = _ref_double_conv(x, w1, b1, g1, be1, w2, b2, g2, be2)
    ref = jax.block_until_ready(ref)

    # Tolerance sized for the bf16 re-quantized intermediate: two independent
    # implementations can round the conv1+BN1 output to adjacent bf16 values
    # (1 ulp ~ 0.4%), which the second conv + BN amplifies to at most ~1e-2 on
    # isolated elements; typical error is ~1e-4.
    np.testing.assert_allclose(np.asarray(out), np.asarray(ref),
                               rtol=1e-2, atol=1e-2)
    print("KERNEL_OK")
</pallas_src>

<mosaic_0001>
module attributes {stable_mosaic.version = 11 : i64} {
  func.func @_double_conv_kernel(%arg0: memref<2x18x64xbf16, #tpu.memory_space<vmem>>, %arg1: memref<192x128xbf16, #tpu.memory_space<vmem>>, %arg2: memref<1x128xf32, #tpu.memory_space<vmem>>, %arg3: memref<1x128xf32, #tpu.memory_space<vmem>>, %arg4: memref<384x128xbf16, #tpu.memory_space<vmem>>, %arg5: memref<1x128xf32, #tpu.memory_space<vmem>>, %arg6: memref<1x128xf32, #tpu.memory_space<vmem>>, %arg7: memref<2x16x128xf32, #tpu.memory_space<vmem>>) attributes {dimension_semantics = [], scalar_prefetch = 0 : i64, scratch_operands = 0 : i64, tpu.core_type = #tpu.core_type<tc>} {
    %c0 = arith.constant 0 : index
    %c0_0 = arith.constant 0 : index
    %c0_1 = arith.constant 0 : index
    %0 = vector.load %arg0[%c0, %c0_0, %c0_1] : memref<2x18x64xbf16, #tpu.memory_space<vmem>>, vector<2x18x64xbf16>
    %1 = vector.extract_strided_slice %0 {offsets = [0, 0, 0], sizes = [2, 16, 64], strides = [1, 1, 1]} : vector<2x18x64xbf16> to vector<2x16x64xbf16>
    %2 = vector.extract_strided_slice %0 {offsets = [0, 1, 0], sizes = [2, 16, 64], strides = [1, 1, 1]} : vector<2x18x64xbf16> to vector<2x16x64xbf16>
    %3 = vector.extract_strided_slice %0 {offsets = [0, 2, 0], sizes = [2, 16, 64], strides = [1, 1, 1]} : vector<2x18x64xbf16> to vector<2x16x64xbf16>
    %4 = tpu.concatenate %1, %2, %3 in 2 : vector<2x16x64xbf16>, vector<2x16x64xbf16>, vector<2x16x64xbf16> -> vector<2x16x192xbf16>
    %5 = vector.shape_cast %4 : vector<2x16x192xbf16> to vector<32x192xbf16>
    %c0_2 = arith.constant 0 : index
    %c0_3 = arith.constant 0 : index
    %6 = vector.load %arg1[%c0_2, %c0_3] : memref<192x128xbf16, #tpu.memory_space<vmem>>, vector<192x128xbf16>
    %cst = arith.constant dense<0.000000e+00> : vector<32x128xf32>
    %7 = tpu.matmul %5, %6, %cst {dimension_numbers = #tpu.dot_dimension_numbers<[1], [0], [0], [1], [0, 0, 1, 1], [], []>} : vector<32x192xbf16>, vector<192x128xbf16>, vector<32x128xf32> -> vector<32x128xf32>
    %c0_4 = arith.constant 0 : index
    %c0_5 = arith.constant 0 : index
    %8 = vector.load %arg2[%c0_4, %c0_5] : memref<1x128xf32, #tpu.memory_space<vmem>>, vector<1x128xf32>
    %c0_6 = arith.constant 0 : index
    %c0_7 = arith.constant 0 : index
    %9 = vector.load %arg3[%c0_6, %c0_7] : memref<1x128xf32, #tpu.memory_space<vmem>>, vector<1x128xf32>
    %cst_8 = arith.constant dense<0.000000e+00> : vector<128xf32>
    %10 = vector.multi_reduction <add>, %7, %cst_8 [0] : vector<32x128xf32> to vector<128xf32>
    %11 = vector.shape_cast %10 : vector<128xf32> to vector<1x128xf32>
    %12 = arith.mulf %7, %7 : vector<32x128xf32>
    %cst_9 = arith.constant dense<0.000000e+00> : vector<128xf32>
    %13 = vector.multi_reduction <add>, %12, %cst_9 [0] : vector<32x128xf32> to vector<128xf32>
    %14 = vector.shape_cast %13 : vector<128xf32> to vector<1x128xf32>
    %15 = tpu.concatenate %11, %14 in 0 : vector<1x128xf32>, vector<1x128xf32> -> vector<2x128xf32>
    %c8_i32 = arith.constant 8 : i32
    %16 = tpu.dynamic_rotate %15 by %c8_i32 dim 1 : vector<2x128xf32>, i32 -> vector<2x128xf32>
    %17 = arith.addf %15, %16 : vector<2x128xf32>
    %c16_i32 = arith.constant 16 : i32
    %18 = tpu.dynamic_rotate %17 by %c16_i32 dim 1 : vector<2x128xf32>, i32 -> vector<2x128xf32>
    %19 = arith.addf %17, %18 : vector<2x128xf32>
    %c32_i32 = arith.constant 32 : i32
    %20 = tpu.dynamic_rotate %19 by %c32_i32 dim 1 : vector<2x128xf32>, i32 -> vector<2x128xf32>
    %21 = arith.addf %19, %20 : vector<2x128xf32>
    %c64_i32 = arith.constant 64 : i32
    %22 = tpu.dynamic_rotate %21 by %c64_i32 dim 1 : vector<2x128xf32>, i32 -> vector<2x128xf32>
    %23 = arith.addf %21, %22 : vector<2x128xf32>
    %24 = vector.extract_strided_slice %23 {offsets = [0, 0], sizes = [1, 128], strides = [1, 1]} : vector<2x128xf32> to vector<1x128xf32>
    %cst_10 = arith.constant 0.001953125 : f32
    %25 = vector.broadcast %cst_10 : f32 to vector<1x128xf32>
    %26 = arith.mulf %24, %25 : vector<1x128xf32>
    %27 = vector.extract_strided_slice %23 {offsets = [1, 0], sizes = [1, 128], strides = [1, 1]} : vector<2x128xf32> to vector<1x128xf32>
    %cst_11 = arith.constant 0.001953125 : f32
    %28 = vector.broadcast %cst_11 : f32 to vector<1x128xf32>
    %29 = arith.mulf %27, %28 : vector<1x128xf32>
    %30 = arith.mulf %26, %26 : vector<1x128xf32>
    %31 = arith.subf %29, %30 : vector<1x128xf32>
    %32 = vector.broadcast %26 : vector<1x128xf32> to vector<32x128xf32>
    %33 = arith.subf %7, %32 : vector<32x128xf32>
    %cst_12 = arith.constant 9.99999974E-6 : f32
    %34 = vector.broadcast %cst_12 : f32 to vector<1x128xf32>
    %35 = arith.addf %31, %34 : vector<1x128xf32>
    %36 = math.rsqrt %35 : vector<1x128xf32>
    %37 = vector.broadcast %36 : vector<1x128xf32> to vector<32x128xf32>
    %38 = arith.mulf %33, %37 : vector<32x128xf32>
    %39 = vector.broadcast %8 : vector<1x128xf32> to vector<32x128xf32>
    %40 = arith.mulf %38, %39 : vector<32x128xf32>
    %41 = vector.broadcast %9 : vector<1x128xf32> to vector<32x128xf32>
    %42 = arith.addf %40, %41 : vector<32x128xf32>
    %cst_13 = arith.constant 0.000000e+00 : f32
    %43 = vector.broadcast %cst_13 : f32 to vector<32x128xf32>
    %44 = arith.maximumf %42, %43 : vector<32x128xf32>
    %45 = arith.truncf %44 : vector<32x128xf32> to vector<32x128xbf16>
    %46 = vector.shape_cast %45 : vector<32x128xbf16> to vector<2x16x128xbf16>
    %cst_14 = arith.constant 0.000000e+00 : bf16
    %47 = vector.broadcast %cst_14 : bf16 to vector<2x1x128xbf16>
    %48 = tpu.concatenate %47, %46, %47 in 1 : vector<2x1x128xbf16>, vector<2x16x128xbf16>, vector<2x1x128xbf16> -> vector<2x18x128xbf16>
    %49 = vector.extract_strided_slice %48 {offsets = [0, 0, 0], sizes = [2, 16, 128], strides = [1, 1, 1]} : vector<2x18x128xbf16> to vector<2x16x128xbf16>
    %50 = vector.extract_strided_slice %48 {offsets = [0, 1, 0], sizes = [2, 16, 128], strides = [1, 1, 1]} : vector<2x18x128xbf16> to vector<2x16x128xbf16>
    %51 = vector.extract_strided_slice %48 {offsets = [0, 2, 0], sizes = [2, 16, 128], strides = [1, 1, 1]} : vector<2x18x128xbf16> to vector<2x16x128xbf16>
    %52 = tpu.concatenate %49, %50, %51 in 2 : vector<2x16x128xbf16>, vector<2x16x128xbf16>, vector<2x16x128xbf16> -> vector<2x16x384xbf16>
    %53 = vector.shape_cast %52 : vector<2x16x384xbf16> to vector<32x384xbf16>
    %c0_15 = arith.constant 0 : index
    %c0_16 = arith.constant 0 : index
    %54 = vector.load %arg4[%c0_15, %c0_16] : memref<384x128xbf16, #tpu.memory_space<vmem>>, vector<384x128xbf16>
    %cst_17 = arith.constant dense<0.000000e+00> : vector<32x128xf32>
    %55 = tpu.matmul %53, %54, %cst_17 {dimension_numbers = #tpu.dot_dimension_numbers<[1], [0], [0], [1], [0, 0, 1, 1], [], []>} : vector<32x384xbf16>, vector<384x128xbf16>, vector<32x128xf32> -> vector<32x128xf32>
    %c0_18 = arith.constant 0 : index
    %c0_19 = arith.constant 0 : index
    %56 = vector.load %arg5[%c0_18, %c0_19] : memref<1x128xf32, #tpu.memory_space<vmem>>, vector<1x128xf32>
    %c0_20 = arith.constant 0 : index
    %c0_21 = arith.constant 0 : index
    %57 = vector.load %arg6[%c0_20, %c0_21] : memref<1x128xf32, #tpu.memory_space<vmem>>, vector<1x128xf32>
    %cst_22 = arith.constant dense<0.000000e+00> : vector<128xf32>
    %58 = vector.multi_reduction <add>, %55, %cst_22 [0] : vector<32x128xf32> to vector<128xf32>
    %59 = vector.shape_cast %58 : vector<128xf32> to vector<1x128xf32>
    %60 = arith.mulf %55, %55 : vector<32x128xf32>
    %cst_23 = arith.constant dense<0.000000e+00> : vector<128xf32>
    %61 = vector.multi_reduction <add>, %60, %cst_23 [0] : vector<32x128xf32> to vector<128xf32>
    %62 = vector.shape_cast %61 : vector<128xf32> to vector<1x128xf32>
    %63 = tpu.concatenate %59, %62 in 0 : vector<1x128xf32>, vector<1x128xf32> -> vector<2x128xf32>
    %c8_i32_24 = arith.constant 8 : i32
    %64 = tpu.dynamic_rotate %63 by %c8_i32_24 dim 1 : vector<2x128xf32>, i32 -> vector<2x128xf32>
    %65 = arith.addf %63, %64 : vector<2x128xf32>
    %c16_i32_25 = arith.constant 16 : i32
    %66 = tpu.dynamic_rotate %65 by %c16_i32_25 dim 1 : vector<2x128xf32>, i32 -> vector<2x128xf32>
    %67 = arith.addf %65, %66 : vector<2x128xf32>
    %c32_i32_26 = arith.constant 32 : i32
    %68 = tpu.dynamic_rotate %67 by %c32_i32_26 dim 1 : vector<2x128xf32>, i32 -> vector<2x128xf32>
    %69 = arith.addf %67, %68 : vector<2x128xf32>
    %c64_i32_27 = arith.constant 64 : i32
    %70 = tpu.dynamic_rotate %69 by %c64_i32_27 dim 1 : vector<2x128xf32>, i32 -> vector<2x128xf32>
    %71 = arith.addf %69, %70 : vector<2x128xf32>
    %72 = vector.extract_strided_slice %71 {offsets = [0, 0], sizes = [1, 128], strides = [1, 1]} : vector<2x128xf32> to vector<1x128xf32>
    %cst_28 = arith.constant 0.001953125 : f32
    %73 = vector.broadcast %cst_28 : f32 to vector<1x128xf32>
    %74 = arith.mulf %72, %73 : vector<1x128xf32>
    %75 = vector.extract_strided_slice %71 {offsets = [1, 0], sizes = [1, 128], strides = [1, 1]} : vector<2x128xf32> to vector<1x128xf32>
    %cst_29 = arith.constant 0.001953125 : f32
    %76 = vector.broadcast %cst_29 : f32 to vector<1x128xf32>
    %77 = arith.mulf %75, %76 : vector<1x128xf32>
    %78 = arith.mulf %74, %74 : vector<1x128xf32>
    %79 = arith.subf %77, %78 : vector<1x128xf32>
    %80 = vector.broadcast %74 : vector<1x128xf32> to vector<32x128xf32>
    %81 = arith.subf %55, %80 : vector<32x128xf32>
    %cst_30 = arith.constant 9.99999974E-6 : f32
    %82 = vector.broadcast %cst_30 : f32 to vector<1x128xf32>
    %83 = arith.addf %79, %82 : vector<1x128xf32>
    %84 = math.rsqrt %83 : vector<1x128xf32>
    %85 = vector.broadcast %84 : vector<1x128xf32> to vector<32x128xf32>
    %86 = arith.mulf %81, %85 : vector<32x128xf32>
    %87 = vector.broadcast %56 : vector<1x128xf32> to vector<32x128xf32>
    %88 = arith.mulf %86, %87 : vector<32x128xf32>
    %89 = vector.broadcast %57 : vector<1x128xf32> to vector<32x128xf32>
    %90 = arith.addf %88, %89 : vector<32x128xf32>
    %cst_31 = arith.constant 0.000000e+00 : f32
    %91 = vector.broadcast %cst_31 : f32 to vector<32x128xf32>
    %92 = arith.maximumf %90, %91 : vector<32x128xf32>
    %93 = vector.shape_cast %92 : vector<32x128xf32> to vector<2x16x128xf32>
    %c0_32 = arith.constant 0 : index
    %c0_33 = arith.constant 0 : index
    %c0_34 = arith.constant 0 : index
    %94 = vector.load %arg7[%c0_32, %c0_33, %c0_34] : memref<2x16x128xf32, #tpu.memory_space<vmem>>, vector<2x16x128xf32>
    tpu.vector_store %arg7[%c0_32, %c0_33, %c0_34], %93 {strides = array<i32>} : memref<2x16x128xf32, #tpu.memory_space<vmem>>, vector<2x16x128xf32>,
    return
  }
}

</mosaic_0001>

<bundles_post_ra>
// kernel: tpu_custom_call.1
= control target key start
LH: loop header
LB: loop body
LE: loop exit
PB: predicated region body
PF: predicated region fallthrough
CT: control target
= control target key end

     0   :  { %12 = vsyncpa [#allocation3], 0  ;;  %s1242_s0 = inlined_call_operand.vmem [shape: bf16[2,18,64], index: 0, kind: input, shape index: {}]   ;;  %s1243_s1 = inlined_call_operand.hbm [shape: bf16[192,128], index: 1, kind: input, shape index: {}]   ;;  %s1244_s2 = inlined_call_operand.vmem [shape: f32[1,128], index: 2, kind: input, shape index: {}]   ;;  %s1245_s3 = inlined_call_operand.vmem [shape: f32[1,128], index: 3, kind: input, shape index: {}]   ;;  %s1246_s4 = inlined_call_operand.hbm [shape: bf16[384,128], index: 4, kind: input, shape index: {}]   ;;  %s1247_s5 = inlined_call_operand.vmem [shape: f32[1,128], index: 5, kind: input, shape index: {}]   ;;  %s1248_s6 = inlined_call_operand.vmem [shape: f32[1,128], index: 6, kind: input, shape index: {}]   ;;  %s1249_s7 = inlined_call_operand.hbm [shape: f32[2,16,128], index: 7, kind: output, shape index: {}]  }
   0x1   :  { %13 = vsyncpa [#allocation6], 0 }
   0x2   :  { %14 = vsyncpa [#allocation4], 0  ;;  %s1050_s24 = smov [#allocation2]   ;;  %s978_s28 = scalar_lea.hbm %s1243_s1, 1536 }
   0x3   :  { %s22_s25 = sshll.u32 %s1050_s24, 4  ;;  %p979_p0 = scmp.ne.s32.totalorder %s1243_s1, %s978_s28  ;;  %s23_s25 = int_to_ptr.vmem [resolvable:$true] %s22_s25 }
   0x4   :  { %p982_p1 = scmp.lt.u32.totalorder %s978_s28, %s1243_s1 }
   0x6   :  { %p984_p2 = pnand %p982_p1, %p979_p0 }
   0x8   :  { %987 = shalt.err (!%p984_p2)
}
   0x9   :  { %s988_s10 = scalar_lea.vmem %s23_s25, 1536  ;;  %p993_p4 = scmp.lt.s32.totalorder %s23_s25, %s23_s25 }
   0xa   :  { %p989_p3 = scmp.ne.s32.totalorder %s23_s25, %s988_s10  ;;  %p994_p5 = scmp.lt.s32.totalorder %s988_s10, %s988_s10 }
   0xc   :  { %p995_p6 = por %p994_p5, %p993_p4 }
   0xe   :  { %p996_p7 = pnand %p995_p6, %p989_p3 }
  0x10   :  { %999 = shalt.err (!%p996_p7)
}
  0x11   :  { %s1051_s11 = smov 64   ;;  %s1052_s12 = smov 4  }
  0x12   :  { %28 = dma.hbm_to_vmem [thread:$0]  %s1243_s1, 1536, %s23_s25, [#allocation3], %s1051_s11, %s1051_s11, %s1052_s12  }
  0x13   :  { %s1053_s15 = smov [#allocation5]   ;;  %s1000_s19 = scalar_lea.hbm %s1246_s4, 3072 }
  0x14   :  { %s38_s16 = sshll.u32 %s1053_s15, 4  ;;  %p1001_p8 = scmp.ne.s32.totalorder %s1246_s4, %s1000_s19  ;;  %s39_s16 = int_to_ptr.vmem [resolvable:$true] %s38_s16 }
  0x15   :  { %p1004_p9 = scmp.lt.u32.totalorder %s1000_s19, %s1246_s4 }
  0x17   :  { %p1006_p10 = pnand %p1004_p9, %p1001_p8 }
  0x19   :  { %1009 = shalt.err (!%p1006_p10)
}
  0x1a   :  { %s1010_s24 = scalar_lea.vmem %s39_s16, 3072  ;;  %p1015_p12 = scmp.lt.s32.totalorder %s39_s16, %s39_s16 }
  0x1b   :  { %p1011_p11 = scmp.ne.s32.totalorder %s39_s16, %s1010_s24  ;;  %p1016_p13 = scmp.lt.s32.totalorder %s1010_s24, %s1010_s24 }
  0x1d   :  { %p1017_p0 = por %p1016_p13, %p1015_p12 }
  0x1f   :  { %p1018_p1 = pnand %p1017_p0, %p1011_p11 }
  0x21   :  { %1021 = shalt.err (!%p1018_p1)
}
  0x22   :  { %44 = dma.hbm_to_vmem [thread:$0]  %s1246_s4, 3072, %s39_s16, [#allocation6], %s1051_s11, %s1051_s11, %s1052_s12  }
  0x23   :  { %1044 = dma.done.wait [#allocation3], 1536  }
  0x24   :  { %1045 = vsyncadd [#allocation3], 4294965760 }
  0x25   :  { %1046 = dma.done.wait [#allocation6], 3072  }
  0x26   :  { %1047 = vsyncadd [#allocation6], 4294964224  ;;  %v1054_v0 = vmov 0   ;;  %vm78_vm0 = vsmask.f32 7424  ;;  %v1131_v1 = vld [vmem:[%s1242_s0] sm:$0xff]  }
  0x27   :  { %223 = vmatprep.subr.bf16.mxu0 %v1054_v0  ;;  %v935_v2 = vld [vmem:[%s1242_s0 + $0x8] ss:$0 sps:$4 sm:$0x11]   ;;  %v1139_v3 = vld [vmem:[%s1242_s0 + $0xc] sm:$0xff]   ;;  %v80_v4 = vshrl.u32 %v1131_v1, 16  ;;  %v82_v5 = vshll.u32 %v1131_v1, 16 }
  0x28   :  { %v87_v6 = vshll.u32 %v935_v2, 16  ;;  %v937_v7 = vld [vmem:[%s1242_s0 + $0x14] ss:$0 sps:$4 sm:$0x11]   ;;  %v92_v8 = vshrl.u32 %v1139_v3, 16  ;;  %v94_v9 = vshll.u32 %v1139_v3, 16 }
  0x29   :  { %v84_v10 = vrot.slane %v82_v5, 1  ;;  %v99_v12 = vshll.u32 %v937_v7, 16  ;;  %v938_v13 = vld [vmem:[#allocation2] sm:$0xff]   ;;  %v939_v17 = vld [vmem:[#allocation2 + $0x8] sm:$0xff]   ;;  %vm107_vm1 = vcmask 1046528   ;;  %v108_v19 = vrot.slane %v1131_v1, 1 }
  0x2a   :  { %v89_v11 = vrot.slane %v87_v6, 1  ;;  %v96_v14 = vrot.slane %v94_v9, 1  ;;  %224 = vmatpush1.bf16.msra.mxu0 %v938_v13  ;;  %v109_v21 = vrot.slane %v935_v2, 1  ;;  %vm114_vm2 = vcmask 523264   ;;  %v940_v23 = vld [vmem:[#allocation2 + $0x10] sm:$0xff]   ;;  %v941_v25 = vld [vmem:[#allocation2 + $0x18] sm:$0xff]  }
  0x2b   :  { %v85_v15 = vor.u32 %v84_v10, %v80_v4  ;;  %v101_v16 = vrot.slane %v99_v12, 1  ;;  %225 = vmatprep.subr.bf16.mxu0 %v1054_v0  ;;  %v942_v26 = vld [vmem:[#allocation2 + $0x20] sm:$0xff]   ;;  %v943_v27 = vld [vmem:[#allocation2 + $0x28] sm:$0xff]   ;;  %v944_v28 = vld [vmem:[#allocation2 + $0x30] sm:$0xff]   ;;  %v111_v34 = vrot.slane %v1139_v3, 1  ;;  %v112_v35 = vrot.slane %v937_v7, 1 }
  0x2c   :  { %v97_v18 = vor.u32 %v96_v14, %v92_v8  ;;  %v110_v24 = vsel %vm107_vm1, %v108_v19, %v109_v21  ;;  %v945_v29 = vld [vmem:[#allocation2 + $0x38] sm:$0xff]   ;;  %v946_v30 = vld [vmem:[#allocation2 + $0x40] sm:$0xff]   ;;  %v947_v31 = vld [vmem:[#allocation2 + $0x48] sm:$0xff]   ;;  %vm296_vm3 = vcmask 1040384   ;;  %s1055_s0 = smov 8   ;;  %s1056_s10 = smov 16  }
  0x2d   :  { %v90_v20 = vsel %vm78_vm0, %v85_v15, %v89_v11  ;;  %836 = vmatprep.mubr.msk.bf16.mxu0 %vm114_vm2, %v110_v24  ;;  %v948_v32 = vld [vmem:[#allocation2 + $0x50] sm:$0xff]   ;;  %v949_v33 = vld [vmem:[#allocation2 + $0x58] sm:$0xff]   ;;  %v113_v37 = vsel %vm107_vm1, %v111_v34, %v112_v35  ;;  %s1057_s12 = smov 32   ;;  %v950_v14 = vld [vmem:[#allocation5 + $0x40] sm:$0xff]   ;;  %v316_v35 = vlaneseq  ;;  %vm379_vm4 = vsmask.f32 256 }
  0x2e   :  { %103 = vrot.lane.b32.xlu0 %v90_v20, %s1051_s11  ;;  %v102_v22 = vsel %vm78_vm0, %v97_v18, %v101_v16  ;;  %226 = vmatpush1.bf16.msra.mxu0 %v939_v17  ;;  %v951_v15 = vld [vmem:[#allocation5] sm:$0xff]   ;;  %v952_v16 = vld [vmem:[#allocation5 + $0x48] sm:$0xff]   ;;  %v954_v18 = vld [vmem:[#allocation5 + $0x50] sm:$0xff]   ;;  %s1058_s18 = smov [#allocation7]  }
  0x2f   :  { %227 = vmatprep.subr.bf16.mxu0 %v1054_v0  ;;  %866 = vmatprep.subr.bf16.mxu1 %v950_v14  ;;  %v953_v17 = vld [vmem:[#allocation5 + $0x8] sm:$0xff]   ;;  %v955_v19 = vld [vmem:[#allocation5 + $0x10] sm:$0xff]   ;;  %v956_v20 = vld [vmem:[#allocation5 + $0x58] sm:$0xff]   ;;  %s807_s19 = sshll.u32 %s1058_s18, 4  ;;  %s808_s19 = int_to_ptr.vmem [resolvable:$true] %s807_s19 }
  0x30   :  { %867 = vmatpush3.bf16.msra.mxu1 %v951_v15  ;;  %v957_v21 = vld [vmem:[#allocation5 + $0x18] sm:$0xff]   ;;  %v960_v24 = vld [vmem:[#allocation5 + $0x68] sm:$0xff]   ;;  %vm380_vm5 = vmand %vm296_vm3, %vm379_vm4  ;;  %p1027_p3 = scmp.lt.s32.totalorder %s808_s19, %s808_s19 }
  0x31   :  { %868 = vmatprep.subr.bf16.mxu1 %v952_v16 }
  0x32   :  { %105 = vrot.lane.b32.xlu0 %v102_v22, %s1051_s11  ;;  %228 = vmatpush1.bf16.msra.mxu0 %v940_v23  ;;  %v958_v22 = vld [vmem:[#allocation5 + $0x60] sm:$0xff]  }
  0x33   :  { %229 = vmatprep.subr.bf16.mxu0 %v1054_v0  ;;  %v959_v23 = vld [vmem:[#allocation5 + $0x20] sm:$0xff]  }
  0x34   :  { %869 = vmatpush3.bf16.msra.mxu1 %v953_v17 }
  0x35   :  { %870 = vmatprep.subr.bf16.mxu1 %v954_v18 }
  0x36   :  { %230 = vmatpush1.bf16.msra.mxu0 %v941_v25  ;;  %v961_v25 = vld [vmem:[#allocation5 + $0x28] sm:$0xff]  }
  0x37   :  { %231 = vmatprep.subr.bf16.mxu0 %v1054_v0 }
  0x38   :  { %871 = vmatpush3.bf16.msra.mxu1 %v955_v19 }
  0x39   :  { %872 = vmatprep.subr.bf16.mxu1 %v956_v20 }
  0x3a   :  { %232 = vmatpush1.bf16.msra.mxu0 %v942_v26  ;;  %v962_v26 = vld [vmem:[#allocation5 + $0x70] sm:$0xff]  }
  0x3b   :  { %233 = vmatprep.subr.bf16.mxu0 %v1054_v0 }
  0x3c   :  { %873 = vmatpush3.bf16.msra.mxu1 %v957_v21 }
  0x3d   :  { %874 = vmatprep.subr.bf16.mxu1 %v958_v22 }
  0x3e   :  { %234 = vmatpush1.bf16.msra.mxu0 %v943_v27  ;;  %v963_v27 = vld [vmem:[#allocation5 + $0x30] sm:$0xff]  }
  0x3f   :  { %235 = vmatprep.subr.bf16.mxu0 %v1054_v0 }
  0x40   :  { %875 = vmatpush3.bf16.msra.mxu1 %v959_v23 }
  0x41   :  { %876 = vmatprep.subr.bf16.mxu1 %v960_v24 }
  0x42   :  { %236 = vmatpush1.bf16.msra.mxu0 %v944_v28  ;;  %v964_v28 = vld [vmem:[#allocation5 + $0x78] sm:$0xff]  }
  0x43   :  { %237 = vmatprep.subr.bf16.mxu0 %v1054_v0 }
  0x44   :  { %877 = vmatpush3.bf16.msra.mxu1 %v961_v25 }
  0x45   :  { %878 = vmatprep.subr.bf16.mxu1 %v962_v26 }
  0x46   :  { %238 = vmatpush1.bf16.msra.mxu0 %v945_v29  ;;  %v965_v29 = vld [vmem:[#allocation5 + $0x38] sm:$0xff]  }
  0x47   :  { %239 = vmatprep.subr.bf16.mxu0 %v1054_v0 }
  0x48   :  { %879 = vmatpush3.bf16.msra.mxu1 %v963_v27 }
  0x49   :  { %880 = vmatprep.subr.bf16.mxu1 %v964_v28 }
  0x4a   :  { %240 = vmatpush1.bf16.msra.mxu0 %v946_v30  ;;  %v1187_v30 = vld [vmem:[#allocation5 + $0x80] sm:$0xff]  }
  0x4b   :  { %241 = vmatprep.subr.bf16.mxu0 %v1054_v0 }
  0x4c   :  { %881 = vmatpush3.bf16.msra.mxu1 %v965_v29 }
  0x4d   :  { %904 = vmatprep.subr.bf16.mxu1 %v1187_v30 }
  0x4e   :  { %242 = vmatpush1.bf16.msra.mxu0 %v947_v31 }
  0x4f   :  { %243 = vmatprep.subr.bf16.mxu0 %v1054_v0 }
  0x52   :  { %244 = vmatpush1.bf16.msra.mxu0 %v948_v32 }
  0x53   :  { %245 = vmatprep.subr.bf16.mxu0 %v1054_v0 }
  0x56   :  { %246 = vmatpush1.bf16.msra.mxu0 %v949_v33 }
  0xa0   :  { %v104_v36 = vpop.permute.xlu0 %103 }
  0xa1   :  { %v116_v38 = vsel %vm114_vm2, %v1131_v1, %v104_v36 }
  0xa2   :  { %256 = vmatmul.mubr.bf16.vlgmr.msra.gmra.mrb[0].mxu0 %v116_v38  ;;  %v1190_v38 = vshrl.u32 %v316_v35, 7 }
  0xa3   :  { %837 = vmatprep.mubr.msk.bf16.mxu0 %vm114_vm2, %v113_v37 }
  0xa4   :  { %v106_v39 = vpop.permute.xlu0 %105 }
  0xa5   :  { %v119_v40 = vsel %vm114_vm2, %v1139_v3, %v106_v39 }
  0xaa   :  { %264 = vmatmul.mubr.bf16.gmra.mrb[4].mxu0 %v119_v40  ;;  %v318_v40 = vsub.s32 0, %v1190_v38 }
 0x175   :  { %v1162_v41 = vpop.f32.mrb[0].mxu0 }
 0x176   :  { %v259_v42 = vpop.f32.mrb[1].mxu0  ;;  %v283_v44 = vmul.f32 %v1162_v41, %v1162_v41 }
 0x177   :  { %v1164_v43 = vpop.f32.mrb[2].mxu0 }
 0x178   :  { %v274_v45 = vadd.f32 %v1164_v43, %v1162_v41  ;;  %v284_v46 = vmul.f32 %v1164_v43, %v1164_v43  ;;  %v262_v47 = vpop.f32.mrb[3].mxu0 }
 0x17a   :  { %v287_v48 = vadd.f32 %v284_v46, %v283_v44  ;;  %v328_v44 = vsub.s32 1, %v1190_v38 }
 0x17d   :  { %v1172_v49 = vpop.f32.mrb[4].mxu0 }
 0x17e   :  { %v275_v50 = vadd.f32 %v274_v45, %v1172_v49  ;;  %v285_v51 = vmul.f32 %v1172_v49, %v1172_v49  ;;  %v267_v52 = vpop.f32.mrb[5].mxu0 }
 0x17f   :  { %v1177_v53 = vpop.f32.mrb[6].mxu0  ;;  %v838_v52 = vld [vmem:[%s1244_s2] ss:$0 sm:$0xff] }
 0x180   :  { %v288_v54 = vadd.f32 %v287_v48, %v285_v51  ;;  %v276_v55 = vadd.f32 %v275_v50, %v1177_v53  ;;  %v286_v56 = vmul.f32 %v1177_v53, %v1177_v53  ;;  %v270_v57 = vpop.f32.mrb[7].mxu0 }
 0x182   :  { %v277_v58 = vrot.slane %v276_v55, 4  ;;  %v289_v59 = vadd.f32 %v288_v54, %v286_v56 }
 0x184   :  { %v278_v60 = vadd.f32 %v277_v58, %v276_v55  ;;  %v290_v61 = vrot.slane %v289_v59, 4 }
 0x186   :  { %v279_v62 = vrot.slane %v278_v60, 2  ;;  %v291_v63 = vadd.f32 %v290_v61, %v289_v59 }
 0x188   :  { %v280_v0 = vadd.f32 %v279_v62, %v278_v60  ;;  %v292_v1 = vrot.slane %v291_v63, 2 }
 0x18a   :  { %v281_v2 = vrot.slane %v280_v0, 1  ;;  %v293_v3 = vadd.f32 %v292_v1, %v291_v63 }
 0x18c   :  { %v294_v4 = vrot.slane %v293_v3, 1  ;;  %v282_v5 = vadd.f32 %v281_v2, %v280_v0 }
 0x18e   :  { %v295_v6 = vadd.f32 %v294_v4, %v293_v3 }
 0x190   :  { %v297_v7 = vsel %vm296_vm3, %v282_v5, %v295_v6 }
 0x191   :  { %298 = vrot.lane.b32.xlu1 %v297_v7, %s1055_s0 }
 0x203   :  { %v299_v8 = vpop.permute.xlu1 %298 }
 0x204   :  { %v300_v9 = vadd.f32 %v299_v8, %v297_v7 }
 0x206   :  { %301 = vrot.lane.b32.xlu1 %v300_v9, %s1056_s10 }
 0x278   :  { %v302_v10 = vpop.permute.xlu1 %301 }
 0x279   :  { %v303_v11 = vadd.f32 %v302_v10, %v300_v9 }
 0x27b   :  { %304 = vrot.lane.b32.xlu0 %v303_v11, %s1057_s12 }
 0x2ed   :  { %v305_v12 = vpop.permute.xlu0 %304 }
 0x2ee   :  { %v306_v13 = vadd.f32 %v305_v12, %v303_v11 }
 0x2f0   :  { %307 = vrot.lane.b32.xlu1 %v306_v13, %s1051_s11 }
 0x362   :  { %v308_v31 = vpop.permute.xlu1 %307 }
 0x363   :  { %v309_v32 = vadd.f32 %v308_v31, %v306_v13  ;;  %v967_v31 = vld [vmem:[#allocation5 + $0x88] sm:$0xff]  }
 0x365   :  { %v310_v33 = vmul.f32 0.001953125, %v309_v32 }
 0x367   :  { %v311_v34 = vmul.f32 %v310_v33, %v310_v33  ;;  %v319_v42 = vrot.slane %v310_v33, %v318_v40 }
 0x369   :  { %v313_v36 = vrot.slane %v311_v34, 7  ;;  %v320_v46 = vsub.f32 %v1162_v41, %v319_v42  ;;  %v321_v47 = vsub.f32 %v1164_v43, %v319_v42  ;;  %v322_v48 = vsub.f32 %v1172_v49, %v319_v42  ;;  %v839_v41 = vld [vmem:[%s1245_s3] ss:$0 sm:$0xff] }
 0x36a   :  { %v323_v50 = vsub.f32 %v1177_v53, %v319_v42  ;;  %v971_v42 = vld [vmem:[#allocation5 + $0xa8] sm:$0xff]  }
 0x36b   :  { %v315_v37 = vsub.f32 %v310_v33, %v313_v36  ;;  %v968_v33 = vld [vmem:[#allocation5 + $0x90] sm:$0xff]   ;;  %v969_v36 = vld [vmem:[#allocation5 + $0x98] sm:$0xff]  }
 0x36d   :  { %v324_v39 = vadd.f32 1e-05, %v315_v37 }
 0x36f   :  { %974 = vrsqrt.f32 %v324_v39  ;;  %v970_v39 = vld [vmem:[#allocation5 + $0xa0] sm:$0xff]  }
 0x379   :  { %v975_v45 = vpop.eup %974 }
 0x37a   :  { %v329_v51 = vrot.slane %v975_v45, %v328_v44  ;;  %v973_v45 = vld [vmem:[#allocation5 + $0xb8] sm:$0xff]  }
 0x37c   :  { %v330_v54 = vmul.f32 %v329_v51, %v320_v46  ;;  %v331_v55 = vmul.f32 %v329_v51, %v321_v47  ;;  %v332_v56 = vmul.f32 %v329_v51, %v322_v48  ;;  %v333_v57 = vmul.f32 %v329_v51, %v323_v50 }
 0x37e   :  { %v340_v43 = vmul.f32 %v838_v52, %v330_v54  ;;  %v341_v58 = vmul.f32 %v838_v52, %v331_v55  ;;  %v342_v49 = vmul.f32 %v838_v52, %v332_v56  ;;  %v343_v59 = vmul.f32 %v838_v52, %v333_v57 }
 0x380   :  { %v350_v53 = vadd.f32 %v839_v41, %v340_v43  ;;  %v351_v60 = vadd.f32 %v839_v41, %v341_v58  ;;  %v352_v61 = vadd.f32 %v839_v41, %v342_v49  ;;  %v353_v62 = vadd.f32 %v839_v41, %v343_v59 }
 0x382   :  { %v354_v63 = vmax.f32 %v350_v53, 0.0  ;;  %v355_v0 = vmax.f32 %v351_v60, 0.0  ;;  %v356_v1 = vmax.f32 %v352_v61, 0.0  ;;  %v357_v2 = vmax.f32 %v353_v62, 0.0 }
 0x384   :  { %v358_v3 = vpack.c.bf16 %v355_v0, %v354_v63  ;;  %v359_v4 = vpack.c.bf16 %v357_v2, %v356_v1 }
 0x386   :  { %v361_v5 = vshrl.u32 %v358_v3, 16  ;;  %v368_v6 = vshrl.u32 %v359_v4, 16  ;;  %v364_v8 = vshll.u32 %v358_v3, 16  ;;  %v371_v10 = vshll.u32 %v359_v4, 16 }
 0x388   :  { %v363_v7 = vrot.slane %v361_v5, 7  ;;  %v370_v9 = vrot.slane %v368_v6, 7 }
 0x38a   :  { %v366_v11 = vor.u32 %v364_v8, %v363_v7  ;;  %v383_v12 = vsel %vm380_vm5, %v363_v7, 0  ;;  %v373_v13 = vor.u32 %v371_v10, %v370_v9  ;;  %v384_v16 = vsel %vm380_vm5, %v370_v9, 0 }
 0x38b   :  { %v393_v18 = vshll.u32 %v383_v12, 16  ;;  %v405_v22 = vshll.u32 %v384_v16, 16  ;;  %v416_v35 = vrot.slane %v383_v12, 1  ;;  %v419_v47 = vrot.slane %v384_v16, 1 }
 0x38c   :  { %v381_v14 = vsel %vm380_vm5, 0, %v366_v11  ;;  %v382_v15 = vsel %vm380_vm5, 0, %v373_v13 }
 0x38d   :  { %v388_v17 = vshll.u32 %v381_v14, 16  ;;  %v400_v19 = vshll.u32 %v382_v15, 16  ;;  %v386_v20 = vshrl.u32 %v381_v14, 16  ;;  %v398_v23 = vshrl.u32 %v382_v15, 16 }
 0x38e   :  { %v395_v26 = vrot.slane %v393_v18, 1  ;;  %v407_v29 = vrot.slane %v405_v22, 1  ;;  %v415_v34 = vrot.slane %v381_v14, 1  ;;  %v418_v46 = vrot.slane %v382_v15, 1 }
 0x38f   :  { %v390_v21 = vrot.slane %v388_v17, 1  ;;  %v402_v24 = vrot.slane %v400_v19, 1 }
 0x390   :  { %v417_v37 = vsel %vm107_vm1, %v415_v34, %v416_v35  ;;  %v420_v48 = vsel %vm107_vm1, %v418_v46, %v419_v47 }
 0x391   :  { %v391_v25 = vor.u32 %v390_v21, %v386_v20  ;;  %v403_v27 = vor.u32 %v402_v24, %v398_v23 }
 0x393   :  { %v396_v28 = vsel %vm78_vm0, %v391_v25, %v395_v26  ;;  %v408_v32 = vsel %vm78_vm0, %v403_v27, %v407_v29 }
 0x394   :  { %647 = vmatprep.mubr.bf16.mxu1 %v396_v28 }
 0x395   :  { %648 = vmatmul.mubr.bf16.vlgmr.msra.gmra.mrb[0].mxu1 %v381_v14 }
 0x396   :  { %905 = vmatpush3.bf16.msra.mxu1 %v1187_v30  ;;  %655 = vmatprep.mubr.bf16.mxu1 %v408_v32  ;;  %v972_v30 = vld [vmem:[#allocation5 + $0xb0] sm:$0xff]  }
 0x397   :  { %906 = vmatprep.subr.bf16.mxu1 %v967_v31 }
 0x39a   :  { %907 = vmatpush3.bf16.msra.mxu1 %v967_v31 }
 0x39b   :  { %908 = vmatprep.subr.bf16.mxu1 %v968_v33 }
 0x39d   :  { %656 = vmatmul.mubr.bf16.gmra.mrb[4].mxu1 %v382_v15 }
 0x39e   :  { %909 = vmatpush3.bf16.msra.mxu1 %v968_v33  ;;  %920 = vmatprep.mubr.bf16.mxu1 %v417_v37 }
 0x39f   :  { %910 = vmatprep.subr.bf16.mxu1 %v969_v36 }
 0x3a2   :  { %911 = vmatpush3.bf16.msra.mxu1 %v969_v36 }
 0x3a3   :  { %912 = vmatprep.subr.bf16.mxu1 %v970_v39 }
 0x3a6   :  { %913 = vmatpush3.bf16.msra.mxu1 %v970_v39 }
 0x3a7   :  { %914 = vmatprep.subr.bf16.mxu1 %v971_v42 }
 0x3aa   :  { %915 = vmatpush3.bf16.msra.mxu1 %v971_v42 }
 0x3ab   :  { %916 = vmatprep.subr.bf16.mxu1 %v972_v30 }
 0x3ae   :  { %917 = vmatpush3.bf16.msra.mxu1 %v972_v30 }
 0x3af   :  { %918 = vmatprep.subr.bf16.mxu1 %v973_v45 }
 0x3b2   :  { %919 = vmatpush3.bf16.msra.mxu1 %v973_v45 }
 0x3b5   :  { %921 = vmatmul.mubr.bf16.vlgmr.msra.gmra.mrb[8].mxu1 %v420_v48 }
 0x468   :  { %v882_v50 = vpop.f32.mrb[0].mxu1 }
 0x469   :  { %v883_v51 = vpop.f32.mrb[1].mxu1 }
 0x46a   :  { %v884_v52 = vadd.f32 %v883_v51, %v882_v50  ;;  %v885_v54 = vpop.f32.mrb[2].mxu1 }
 0x46b   :  { %v886_v55 = vpop.f32.mrb[3].mxu1 }
 0x46c   :  { %v887_v56 = vadd.f32 %v886_v55, %v885_v54 }
 0x470   :  { %v888_v57 = vpop.f32.mrb[4].mxu1 }
 0x471   :  { %v889_v41 = vpop.f32.mrb[5].mxu1 }
 0x472   :  { %v890_v43 = vadd.f32 %v889_v41, %v888_v57  ;;  %v891_v58 = vpop.f32.mrb[6].mxu1 }
 0x473   :  { %v892_v49 = vpop.f32.mrb[7].mxu1 }
 0x474   :  { %v893_v59 = vadd.f32 %v892_v49, %v891_v58 }
 0x488   :  { %v922_v53 = vpop.f32.mrb[8].mxu1 }
 0x489   :  { %v707_v60 = vadd.f32 %v922_v53, %v890_v43  ;;  %v698_v61 = vpop.f32.mrb[9].mxu1 }
 0x48a   :  { %v699_v62 = vadd.f32 %v884_v52, %v698_v61  ;;  %v923_v63 = vpop.f32.mrb[10].mxu1  ;;  %v864_v52 = vld [vmem:[%s1247_s5] ss:$0 sm:$0xff]  ;;  %s1022_s5 = scalar_lea.vmem %s808_s19, 512 }
 0x48b   :  { %v710_v0 = vadd.f32 %v923_v63, %v893_v59  ;;  %v701_v1 = vpop.f32.mrb[11].mxu1  ;;  %v726_v6 = vmul.f32 %v707_v60, %v707_v60  ;;  %p1023_p2 = scmp.ne.s32.totalorder %s808_s19, %s1022_s5  ;;  %p1028_p4 = scmp.lt.s32.totalorder %s1022_s5, %s1022_s5 }
 0x48c   :  { %v702_v2 = vadd.f32 %v887_v56, %v701_v1  ;;  %v724_v3 = vmul.f32 %v699_v62, %v699_v62 }
 0x48d   :  { %v727_v9 = vmul.f32 %v710_v0, %v710_v0  ;;  %p1029_p5 = por %p1028_p4, %p1027_p3 }
 0x48e   :  { %v715_v4 = vadd.f32 %v702_v2, %v699_v62  ;;  %v725_v5 = vmul.f32 %v702_v2, %v702_v2 }
 0x48f   :  { %p1030_p6 = pnand %p1029_p5, %p1023_p2 }
 0x490   :  { %v716_v7 = vadd.f32 %v715_v4, %v707_v60  ;;  %v728_v8 = vadd.f32 %v725_v5, %v724_v3 }
 0x492   :  { %v717_v10 = vadd.f32 %v716_v7, %v710_v0  ;;  %v729_v11 = vadd.f32 %v728_v8, %v726_v6 }
 0x494   :  { %v718_v12 = vrot.slane %v717_v10, 4  ;;  %v730_v13 = vadd.f32 %v729_v11, %v727_v9 }
 0x496   :  { %v719_v14 = vadd.f32 %v718_v12, %v717_v10  ;;  %v731_v15 = vrot.slane %v730_v13, 4 }
 0x498   :  { %v720_v16 = vrot.slane %v719_v14, 2  ;;  %v732_v17 = vadd.f32 %v731_v15, %v730_v13 }
 0x49a   :  { %v721_v18 = vadd.f32 %v720_v16, %v719_v14  ;;  %v733_v19 = vrot.slane %v732_v17, 2 }
 0x49c   :  { %v722_v20 = vrot.slane %v721_v18, 1  ;;  %v734_v21 = vadd.f32 %v733_v19, %v732_v17 }
 0x49e   :  { %v735_v22 = vrot.slane %v734_v21, 1  ;;  %v723_v23 = vadd.f32 %v722_v20, %v721_v18 }
 0x4a0   :  { %v736_v24 = vadd.f32 %v735_v22, %v734_v21 }
 0x4a2   :  { %v737_v25 = vsel %vm296_vm3, %v723_v23, %v736_v24 }
 0x4a3   :  { %738 = vrot.lane.b32.xlu0 %v737_v25, %s1055_s0 }
 0x515   :  { %v739_v26 = vpop.permute.xlu0 %738 }
 0x516   :  { %v740_v27 = vadd.f32 %v739_v26, %v737_v25 }
 0x518   :  { %741 = vrot.lane.b32.xlu1 %v740_v27, %s1056_s10 }
 0x58a   :  { %v742_v28 = vpop.permute.xlu1 %741 }
 0x58b   :  { %v743_v29 = vadd.f32 %v742_v28, %v740_v27 }
 0x58d   :  { %744 = vrot.lane.b32.xlu0 %v743_v29, %s1057_s12 }
 0x5ff   :  { %v745_v31 = vpop.permute.xlu0 %744 }
 0x600   :  { %v746_v32 = vadd.f32 %v745_v31, %v743_v29 }
 0x602   :  { %747 = vrot.lane.b32.xlu1 %v746_v32, %s1051_s11 }
 0x674   :  { %v748_v33 = vpop.permute.xlu1 %747 }
 0x675   :  { %v749_v34 = vadd.f32 %v748_v33, %v746_v32 }
 0x677   :  { %v750_v35 = vmul.f32 0.001953125, %v749_v34 }
 0x679   :  { %v751_v36 = vmul.f32 %v750_v35, %v750_v35  ;;  %v759_v30 = vrot.slane %v750_v35, %v318_v40  ;;  %v865_v40 = vld [vmem:[%s1248_s6] ss:$0 sm:$0xff] }
 0x67b   :  { %v753_v37 = vrot.slane %v751_v36, 7  ;;  %v760_v46 = vsub.f32 %v699_v62, %v759_v30  ;;  %v761_v47 = vsub.f32 %v702_v2, %v759_v30  ;;  %v762_v48 = vsub.f32 %v707_v60, %v759_v30 }
 0x67c   :  { %v763_v50 = vsub.f32 %v710_v0, %v759_v30 }
 0x67d   :  { %v755_v39 = vsub.f32 %v750_v35, %v753_v37 }
 0x67f   :  { %v764_v42 = vadd.f32 1e-05, %v755_v39 }
 0x681   :  { %976 = vrsqrt.f32 %v764_v42 }
 0x68b   :  { %v977_v45 = vpop.eup %976 }
 0x68c   :  { %v769_v51 = vrot.slane %v977_v45, %v328_v44 }
 0x68e   :  { %v770_v54 = vmul.f32 %v769_v51, %v760_v46  ;;  %v771_v55 = vmul.f32 %v769_v51, %v761_v47  ;;  %v772_v56 = vmul.f32 %v769_v51, %v762_v48  ;;  %v773_v57 = vmul.f32 %v769_v51, %v763_v50 }
 0x690   :  { %v780_v41 = vmul.f32 %v864_v52, %v770_v54  ;;  %v781_v43 = vmul.f32 %v864_v52, %v771_v55  ;;  %v782_v58 = vmul.f32 %v864_v52, %v772_v56  ;;  %v783_v49 = vmul.f32 %v864_v52, %v773_v57 }
 0x692   :  { %v790_v38 = vadd.f32 %v865_v40, %v780_v41  ;;  %v791_v44 = vadd.f32 %v865_v40, %v781_v43  ;;  %v792_v59 = vadd.f32 %v865_v40, %v782_v58  ;;  %v793_v53 = vadd.f32 %v865_v40, %v783_v49 }
 0x694   :  { %v794_v60 = vmax.f32 %v790_v38, 0.0  ;;  %v795_v61 = vmax.f32 %v791_v44, 0.0  ;;  %v796_v62 = vmax.f32 %v792_v59, 0.0  ;;  %v797_v63 = vmax.f32 %v793_v53, 0.0 }
 0x696   :  { %798 = vst [vmem:[#allocation7] sm:$0xff] %v794_v60  ;;  %799 = vst [vmem:[#allocation7 + $0x8] sm:$0xff] %v795_v61 }
 0x697   :  { %800 = vst [vmem:[#allocation7 + $0x10] sm:$0xff] %v796_v62  ;;  %801 = vst [vmem:[#allocation7 + $0x18] sm:$0xff] %v797_v63 }
 0x698   :  { %1033 = shalt.err (!%p1030_p6)
}
 0x699   :  { %s1034_s21 = scalar_lea.hbm %s1249_s7, 512 }
 0x69a   :  { %p1035_p7 = scmp.ne.s32.totalorder %s1249_s7, %s1034_s21  ;;  %p1038_p8 = scmp.lt.u32.totalorder %s1034_s21, %s1249_s7 }
 0x69c   :  { %p1040_p9 = pnand %p1038_p8, %p1035_p7 }
 0x69e   :  { %1043 = shalt.err (!%p1040_p9)
}
 0x69f   :  { %s1059_s25 = smov 128  }
 0x6a0   :  { %813 = dma.vmem_to_hbm [thread:$0]  %s808_s19, 512, %s1249_s7, [#allocation4], %s1059_s25, %s1059_s25, %s1055_s0  }
 0x6a1   :  { %1048 = dma.done.wait [#allocation4], 512  }
 0x6a2   :  { %1049 = vsyncadd [#allocation4], 4294966784 }
 0x6a3   :  { %817 = vsyncpa [#allocation3], 1 }
 0x6a4   :  { %818 = vsyncpa [#allocation6], 1 }
 0x6a5   :  { %819 = vsyncpa [#allocation4], 1 }

</bundles_post_ra>
